<compile_context>
chip_gen: v5e
topology: v5e:2x2
jax: 0.10.0
libtpu: 0.0.40
codegen_flags: <defaults>
</compile_context>

<pallas_src>
import jax
import jax.numpy as jnp
from jax import lax
from jax.experimental import pallas as pl
from jax.experimental.pallas import tpu as pltpu


def _rope_table_kernel(inv_freq_ref, cos_ref, sin_ref):
    """Write cos/sin(t * inv_freq_dup) for one seq tile.

    inv_freq_ref: (1, dim) f32 -- inv_freq duplicated along last dim (resident)
    cos_ref, sin_ref: (TILE_S, dim) f32
    """
    tile_s, d = cos_ref.shape

    # Positions for this tile: program_id(0) * TILE_S + [0, TILE_S)
    row = lax.broadcasted_iota(jnp.int32, (tile_s, d), 0) + pl.program_id(0) * tile_s
    t = row.astype(jnp.float32)

    # Full-width outer product (1,dim) broadcast against (tile_s,dim).
    freqs = t * inv_freq_ref[...]

    # Single full-width (lane-dense for dim >= 128) store per output.
    cos_ref[...] = jnp.cos(freqs)
    sin_ref[...] = jnp.sin(freqs)


def rotary_positional_embedding(x: jax.Array, seq_len: int, dim: int,
                                base: float = 10000.0, *, tile_s: int | None = None):
    """Pallas equivalent of RotaryPositionalEmbedding.forward.

    Args:
      x: input of shape (T, B, C); only consulted for API parity (never read).
      seq_len: sequence length for the cos/sin table.
      dim: rotary embedding dimension (must be even).
      base: exponential base.
      tile_s: optional seq tile size (multiple of 8, or defaults chosen to fit
              comfortably in scoped VMEM on v5e/v6e/v7x).
    Returns:
      (cos, sin), each (seq_len, 1, 1, dim) float32 — matching the torch module
      (its `precision` arg is never applied in forward).
    """
    del x  # only used for device placement in the torch module
    assert dim % 2 == 0, "rotary dim must be even"
    half = dim // 2

    if tile_s is None:
        # 1024 rows keeps 2 outputs x 2 buffers x tile_s*dim*4B well under the
        # default scoped-VMEM limit on all of v5e (16 MiB) / v6e / v7x (32 MiB)
        # for any realistic dim, while amortizing the ~0.35 us/step overhead.
        tile_s = seq_len if seq_len <= 1024 else 1024
    if tile_s != seq_len:
        assert tile_s % 8 == 0, "tile_s must be a multiple of 8 (sublane tiling)"

    grid = (pl.cdiv(seq_len, tile_s),)

    # Torch buffer: inv_freq = 1 / base ** (arange(0, dim, 2) / dim), float32.
    # Duplicate along the last dim on the host so the kernel's last dim is the
    # full output width (no in-kernel concat, full-width stores).
    inv_freq_half = 1.0 / (base ** (jnp.arange(0, dim, 2, dtype=jnp.float32) / dim))
    inv_freq = jnp.concatenate([inv_freq_half, inv_freq_half]).reshape(1, dim)

    cos_2d, sin_2d = pl.pallas_call(
        _rope_table_kernel,
        out_shape=(
            jax.ShapeDtypeStruct((seq_len, dim), jnp.float32),
            jax.ShapeDtypeStruct((seq_len, dim), jnp.float32),
        ),
        grid=grid,
        in_specs=[
            # Resident: same block every grid step -> DMA'd once.
            pl.BlockSpec((1, dim), lambda i: (0, 0)),
        ],
        out_specs=(
            pl.BlockSpec((tile_s, dim), lambda i: (i, 0)),
            pl.BlockSpec((tile_s, dim), lambda i: (i, 0)),
        ),
        compiler_params=pltpu.CompilerParams(
            # Each grid step writes an independent seq tile -> shardable across
            # both TensorCores on v7x; harmless no-op on v5e/v6e.
            dimension_semantics=("parallel",),
        ),
    )(inv_freq)

    # Glue: add the broadcast axes [:, None, None, :] like the torch module
    # (reshape only, no data movement).
    cos = cos_2d.reshape(seq_len, 1, 1, dim)
    sin = sin_2d.reshape(seq_len, 1, 1, dim)
    return cos, sin


def _reference(seq_len: int, dim: int, base: float = 10000.0):
    """Plain-JAX mirror of the torch math."""
    inv_freq = 1.0 / (base ** (jnp.arange(0, dim, 2, dtype=jnp.float32) / dim))
    t = jnp.arange(seq_len, dtype=jnp.float32)
    freqs = jnp.einsum("i,j->ij", t, inv_freq)
    emb = jnp.concatenate([freqs, freqs], axis=-1)
    return jnp.cos(emb)[:, None, None, :], jnp.sin(emb)[:, None, None, :]


if __name__ == "__main__":
    key = jax.random.PRNGKey(0)

    # --- Small case matching the module's T x B x C input convention ---
    T, B, C = 8, 2, 32
    dim = 32
    seq_len = T
    x = jax.random.normal(key, (T, B, C), dtype=jnp.float32)

    cos, sin = rotary_positional_embedding(x, seq_len=seq_len, dim=dim)
    jax.block_until_ready((cos, sin))

    cos_ref, sin_ref = _reference(seq_len, dim)
    assert cos.shape == (seq_len, 1, 1, dim) and sin.shape == (seq_len, 1, 1, dim)
    assert jnp.allclose(cos, cos_ref, atol=1e-5, rtol=1e-5)
    assert jnp.allclose(sin, sin_ref, atol=1e-5, rtol=1e-5)

    # --- Second case: exercise the seq grid (2 tiles) with a lane-dense dim ---
    seq_len2, dim2 = 256, 128
    x2 = jax.random.normal(key, (seq_len2, B, dim2), dtype=jnp.float32)
    cos2, sin2 = rotary_positional_embedding(x2, seq_len=seq_len2, dim=dim2, tile_s=128)
    jax.block_until_ready((cos2, sin2))

    cos2_ref, sin2_ref = _reference(seq_len2, dim2)
    assert cos2.shape == (seq_len2, 1, 1, dim2)
    # Slightly looser tolerance: larger angles -> a-few-ulp differences between
    # the kernel's and XLA's sin/cos range reduction are expected.
    assert jnp.allclose(cos2, cos2_ref, atol=5e-4, rtol=1e-4)
    assert jnp.allclose(sin2, sin2_ref, atol=5e-4, rtol=1e-4)

    print("KERNEL_OK")
</pallas_src>

<mosaic_0001>
module attributes {stable_mosaic.version = 11 : i64} {
  func.func @_rope_table_kernel(%arg0: i32, %arg1: memref<1x32xf32, #tpu.memory_space<vmem>>, %arg2: memref<8x32xf32, #tpu.memory_space<vmem>>, %arg3: memref<8x32xf32, #tpu.memory_space<vmem>>) attributes {dimension_semantics = [#tpu.dimension_semantics<parallel>], iteration_bounds = array<i64: 1>, scalar_prefetch = 0 : i64, scratch_operands = 0 : i64, tpu.core_type = #tpu.core_type<tc>, window_params = [{pipeline_mode = #tpu.pipeline_mode<synchronous>, transform_indices = @transform_0, window_bounds = array<i64: 1, 32>}, {transform_indices = @transform_1, window_bounds = array<i64: 8, 32>}, {transform_indices = @transform_2, window_bounds = array<i64: 8, 32>}]} {
    %0 = tpu.iota {dimensions = array<i32: 0>} : vector<8x32xi32>
    %c8_i32 = arith.constant 8 : i32
    %1 = arith.muli %arg0, %c8_i32 : i32
    %2 = vector.broadcast %1 : i32 to vector<8x32xi32>
    %3 = arith.addi %0, %2 : vector<8x32xi32>
    %4 = arith.sitofp %3 : vector<8x32xi32> to vector<8x32xf32>
    %c0 = arith.constant 0 : index
    %c0_0 = arith.constant 0 : index
    %5 = vector.load %arg1[%c0, %c0_0] : memref<1x32xf32, #tpu.memory_space<vmem>>, vector<1x32xf32>
    %6 = vector.broadcast %5 : vector<1x32xf32> to vector<8x32xf32>
    %7 = arith.mulf %4, %6 : vector<8x32xf32>
    %8 = math.cos %7 : vector<8x32xf32>
    %c0_1 = arith.constant 0 : index
    %c0_2 = arith.constant 0 : index
    %9 = vector.load %arg2[%c0_1, %c0_2] : memref<8x32xf32, #tpu.memory_space<vmem>>, vector<8x32xf32>
    tpu.vector_store %arg2[%c0_1, %c0_2], %8 {strides = array<i32>} : memref<8x32xf32, #tpu.memory_space<vmem>>, vector<8x32xf32>,
    %10 = math.sin %7 : vector<8x32xf32>
    %c0_3 = arith.constant 0 : index
    %c0_4 = arith.constant 0 : index
    %11 = vector.load %arg3[%c0_3, %c0_4] : memref<8x32xf32, #tpu.memory_space<vmem>>, vector<8x32xf32>
    tpu.vector_store %arg3[%c0_3, %c0_4], %10 {strides = array<i32>} : memref<8x32xf32, #tpu.memory_space<vmem>>, vector<8x32xf32>,
    return
  }
  func.func @transform_0(%arg0: i32) -> (i32, i32) {
    %c0_i32 = arith.constant 0 : i32
    %c0_i32_0 = arith.constant 0 : i32
    %c0_i32_1 = arith.constant 0 : i32
    return %c0_i32, %c0_i32_0 : i32, i32
  }
  func.func @transform_1(%arg0: i32) -> (i32, i32) {
    %c0_i32 = arith.constant 0 : i32
    %c0_i32_0 = arith.constant 0 : i32
    return %arg0, %c0_i32 : i32, i32
  }
  func.func @transform_2(%arg0: i32) -> (i32, i32) {
    %c0_i32 = arith.constant 0 : i32
    %c0_i32_0 = arith.constant 0 : i32
    return %arg0, %c0_i32 : i32, i32
  }
}

</mosaic_0001>

<bundles_post_ra>
// kernel: tpu_custom_call.1
= control target key start
LH: loop header
LB: loop body
LE: loop exit
PB: predicated region body
PF: predicated region fallthrough
CT: control target
= control target key end

     0   :  { %8 = vsyncpa [#allocation3], 0  ;;  %s558_s0 = inlined_call_operand.hbm [shape: f32[1,32], index: 0, kind: input, shape index: {}]   ;;  %s559_s1 = inlined_call_operand.hbm [shape: f32[8,32], index: 1, kind: output, shape index: {0}]   ;;  %s560_s2 = inlined_call_operand.hbm [shape: f32[8,32], index: 2, kind: output, shape index: {1}]  }
   0x1   :  { %9 = vsyncpa [#allocation4], 0 }
   0x2   :  { %10 = vsyncpa [#allocation7], 0  ;;  %s16_s11 = sshll.u32 %s558_s0, 4  ;;  %s477_s12 = smov [#allocation2]   ;;  %s17_s11 = int_to_ptr.hbm [resolvable:$true] %s16_s11 }
   0x3   :  { %s18_s13 = sshll.u32 %s477_s12, 4  ;;  %s19_s13 = int_to_ptr.vmem [resolvable:$true] %s18_s13 }
   0x4   :  { %21 = dma.hbm_to_vmem [thread:$0]  %s17_s11, 16, %s19_s13, [#allocation3]  }
   0x5   :  { %471 = dma.done.wait [#allocation3], 16  }
   0x6   :  { %472 = vsyncadd [#allocation3], 4294967280  ;;  %v26_v0 = vlaneseq  ;;  %v398_v3 = vld [vmem:[#allocation2] ss:$0 sm:$0xff]  ;;  %v478_v16 = vmov 683565275  }
   0x7   :  { %v479_v18 = vmov 2475754826   ;;  %v480_v20 = vmov 2131351028   ;;  %v481_v22 = vmov 2102212464  }
   0x8   :  { %v27_v1 = vshrl.u32 %v26_v0, 7  ;;  %v482_v24 = vmov 920167782   ;;  %v483_v30 = vmov 1326507024   ;;  %s485_s0 = smov [#allocation5]  }
   0x9   :  { %s354_s14 = sshll.u32 %s485_s0, 4  ;;  %s356_s17 = sshll.u32 %s559_s1, 4  ;;  %s355_s14 = int_to_ptr.vmem [resolvable:$true] %s354_s14  ;;  %s357_s17 = int_to_ptr.hbm [resolvable:$true] %s356_s17 }
   0xa   :  { %v31_v2 = vcvt.s32.f32 %v27_v1  ;;  %s486_s18 = smov [#allocation6]   ;;  %s367_s22 = sshll.u32 %s560_s2, 4  ;;  %s368_s22 = int_to_ptr.hbm [resolvable:$true] %s367_s22 }
   0xb   :  { %s365_s19 = sshll.u32 %s486_s18, 4  ;;  %s366_s19 = int_to_ptr.vmem [resolvable:$true] %s365_s19 }
   0xc   :  { %v505_v4 = vmul.f32 %v398_v3, %v31_v2 }
   0xe   :  { %v40_v5 = vand.u32 2139095040, %v505_v4  ;;  %v37_v7 = vand.u32 2147483647, %v505_v4  ;;  %vm39_vm12 = vcmp.lt.s32.totalorder %v505_v4, 0 }
  0x10   :  { %v41_v6 = vshrl.u32 %v40_v5, 23  ;;  %v44_v10 = vand.u32 8388607, %v37_v7  ;;  %v484_v5 = vmov 0   ;;  %vm38_vm13 = vcmp.le.f32.partialorder %v37_v7, 0.7853982 }
  0x12   :  { %v382_v8 = vadd.s32 4294967169, %v41_v6  ;;  %v45_v13 = vor.u32 8388608, %v44_v10 }
  0x14   :  { %v47_v9 = vadd.s32 1, %v382_v8  ;;  %v514_v32 = vshll.u32 %v45_v13, 8 }
  0x16   :  { %vm48_vm0 = vcmp.gt.s32.totalorder %v47_v9, 0  ;;  %v86_v44 = vand.u32 65535, %v514_v32  ;;  %v87_v45 = vshrl.u32 %v514_v32, 16 }
  0x17   :  { %v49_v11 = vsel %vm48_vm0, %v47_v9, 0 }
  0x18   :  { %v51_v12 = vand.u32 31, %v49_v11  ;;  %v511_v14 = vshrl.u32 %v49_v11, 5 }
  0x1a   :  { %v52_v15 = vsub.s32 32, %v51_v12  ;;  %v54_v17 = vshll.u32 %v478_v16, %v51_v12  ;;  %v57_v19 = vshll.u32 %v479_v18, %v51_v12  ;;  %v60_v21 = vshll.u32 %v480_v20, %v51_v12 }
  0x1b   :  { %v63_v23 = vshll.u32 %v481_v22, %v51_v12  ;;  %v66_v25 = vshll.u32 %v482_v24, %v51_v12  ;;  %vm69_vm1 = vcmp.lt.s32.totalorder %v511_v14, 1  ;;  %vm72_vm2 = vcmp.lt.s32.totalorder %v511_v14, 4 }
  0x1c   :  { %v55_v26 = vshrl.u32 %v479_v18, %v52_v15  ;;  %v58_v27 = vshrl.u32 %v480_v20, %v52_v15  ;;  %v61_v28 = vshrl.u32 %v481_v22, %v52_v15  ;;  %v64_v29 = vshrl.u32 %v482_v24, %v52_v15 }
  0x1d   :  { %v67_v31 = vshrl.u32 %v483_v30, %v52_v15  ;;  %vm71_vm3 = vcmp.lt.s32.totalorder %v511_v14, 3  ;;  %vm70_vm4 = vcmp.lt.s32.totalorder %v511_v14, 2  ;;  %v53_v52 = vshrl.u32 %v478_v16, %v52_v15 }
  0x1e   :  { %v56_v33 = vor.u32 %v55_v26, %v54_v17  ;;  %v59_v34 = vor.u32 %v58_v27, %v57_v19  ;;  %v62_v35 = vor.u32 %v61_v28, %v60_v21  ;;  %v65_v36 = vor.u32 %v64_v29, %v63_v23 }
  0x1f   :  { %v68_v37 = vor.u32 %v67_v31, %v66_v25 }
  0x20   :  { %v77_v38 = vsel %vm69_vm1, %v56_v33, %v59_v34  ;;  %v81_v39 = vsel %vm69_vm1, %v59_v34, %v62_v35  ;;  %v78_v40 = vsel %vm72_vm2, %v65_v36, 920167782  ;;  %v73_v1 = vsel %vm69_vm1, %v53_v52, %v56_v33 }
  0x21   :  { %v82_v41 = vsel %vm72_vm2, %v68_v37, 1326507024  ;;  %v79_v42 = vsel %vm71_vm3, %v62_v35, %v78_v40  ;;  %v74_v3 = vsel %vm72_vm2, %v62_v35, 2102212464 }
  0x22   :  { %v83_v43 = vsel %vm71_vm3, %v65_v36, %v82_v41  ;;  %v80_v46 = vsel %vm70_vm4, %v77_v38, %v79_v42  ;;  %v75_v16 = vsel %vm71_vm3, %v59_v34, %v74_v3 }
  0x23   :  { %v84_v47 = vsel %vm70_vm4, %v81_v39, %v83_v43  ;;  %v110_v50 = vand.u32 65535, %v80_v46  ;;  %v111_v51 = vshrl.u32 %v80_v46, 16  ;;  %v76_v24 = vsel %vm70_vm4, %v73_v1, %v75_v16 }
  0x24   :  { %v88_v48 = vand.u32 65535, %v84_v47  ;;  %v89_v49 = vshrl.u32 %v84_v47, 16  ;;  %v130_v28 = vmul.u32 %v514_v32, %v76_v24  ;;  %vm180_vm4 = vweird.f32 %v505_v4 }
  0x25   :  { %v112_v56 = vmul.u32 %v110_v50, %v86_v44  ;;  %v113_v57 = vmul.u32 %v111_v51, %v86_v44  ;;  %v114_v58 = vmul.u32 %v110_v50, %v87_v45  ;;  %v115_v62 = vmul.u32 %v111_v51, %v87_v45 }
  0x26   :  { %v90_v53 = vmul.u32 %v88_v48, %v86_v44  ;;  %v91_v54 = vmul.u32 %v89_v49, %v86_v44  ;;  %v92_v55 = vmul.u32 %v88_v48, %v87_v45  ;;  %v93_v59 = vmul.u32 %v89_v49, %v87_v45 }
  0x27   :  { %v116_v63 = vshll.u32 %v113_v57, 16  ;;  %v118_v0 = vshll.u32 %v114_v58, 16  ;;  %v117_v13 = vshrl.u32 %v113_v57, 16  ;;  %v119_v20 = vshrl.u32 %v114_v58, 16 }
  0x28   :  { %v94_v60 = vshll.u32 %v91_v54, 16  ;;  %v96_v61 = vshll.u32 %v92_v55, 16  ;;  %v95_v9 = vshrl.u32 %v91_v54, 16  ;;  %v97_v17 = vshrl.u32 %v92_v55, 16 }
  0x29   :  { %vm120_vm6 = vc.u32 %v112_v56, %v116_v63  ;;  %v122_v8 = vadd.s32 %v116_v63, %v112_v56 }
  0x2a   :  { %vm98_vm5 = vc.u32 %v90_v53, %v94_v60  ;;  %v100_v2 = vadd.s32 %v94_v60, %v90_v53  ;;  %v121_v11 = vsel %vm120_vm6, 1, %v484_v5 }
  0x2b   :  { %v99_v6 = vsel %vm98_vm5, 1, %v484_v5  ;;  %v123_v15 = vadd.s32 %v121_v11, %v115_v62  ;;  %vm124_vm8 = vc.u32 %v122_v8, %v118_v0  ;;  %v126_v23 = vadd.s32 %v122_v8, %v118_v0 }
  0x2c   :  { %v101_v10 = vadd.s32 %v99_v6, %v93_v59  ;;  %vm102_vm7 = vc.u32 %v100_v2, %v96_v61  ;;  %v125_v19 = vsel %vm124_vm8, 1, %v484_v5  ;;  %vm191_vm5 = vcmask 261120  }
  0x2d   :  { %v103_v12 = vsel %vm102_vm7, 1, %v484_v5  ;;  %v127_v21 = vadd.s32 %v125_v19, %v123_v15 }
  0x2e   :  { %v105_v18 = vadd.s32 %v103_v12, %v101_v10 }
  0x2f   :  { %v128_v25 = vadd.s32 %v127_v21, %v117_v13 }
  0x30   :  { %v106_v22 = vadd.s32 %v105_v18, %v95_v9 }
  0x31   :  { %v129_v27 = vadd.s32 %v128_v25, %v119_v20 }
  0x32   :  { %v107_v26 = vadd.s32 %v106_v22, %v97_v17 }
  0x33   :  { %v133_v29 = vadd.s32 1, %v129_v27 }
  0x34   :  { %vm132_vm9 = vc.u32 %v107_v26, %v126_v23  ;;  %v131_v14 = vadd.s32 %v126_v23, %v107_v26 }
  0x35   :  { %v134_v30 = vsel %vm132_vm9, %v133_v29, %v129_v27 }
  0x36   :  { %v135_v31 = vadd.s32 %v134_v30, %v130_v28 }
  0x38   :  { %v136_v33 = vadd.s32 536870912, %v135_v31 }
  0x3a   :  { %v137_v34 = vshrl.u32 %v136_v33, 30 }
  0x3c   :  { %v138_v35 = vshll.u32 %v137_v34, 30  ;;  %v161_v52 = vsub.s32 4, %v137_v34 }
  0x3e   :  { %v139_v36 = vsub.s32 %v135_v31, %v138_v35  ;;  %v162_v55 = vsel %vm39_vm12, %v161_v52, %v137_v34 }
  0x3f   :  { %v164_v58 = vsel %vm38_vm13, 0, %v162_v55 }
  0x40   :  { %vm140_vm10 = vcmp.lt.s32.totalorder %v139_v36, 0  ;;  %v141_v37 = vsub.s32 0, %v139_v36  ;;  %v337_v63 = vadd.s32 3, %v164_v58  ;;  %v181_v5 = vand.u32 3, %v164_v58 }
  0x42   :  { %v142_v38 = vsel %vm140_vm10, %v141_v37, %v139_v36  ;;  %v338_v6 = vand.u32 3, %v337_v63  ;;  %vm186_vm14 = vcmp.eq.s32.totalorder %v181_v5, 2  ;;  %vm182_vm0 = vcmp.lt.s32.totalorder %v181_v5, 2 }
  0x43   :  { %v143_v39 = vclz %v142_v38  ;;  %vm183_vm1 = vcmp.eq.s32.totalorder %v181_v5, 0 }
  0x44   :  { %vm343_vm15 = vcmp.eq.s32.totalorder %v338_v6, 2  ;;  %vm340_vm2 = vcmp.eq.s32.totalorder %v338_v6, 0  ;;  %vm339_vm3 = vcmp.lt.s32.totalorder %v338_v6, 2 }
  0x45   :  { %v383_v40 = vadd.s32 4294967294, %v143_v39 }
  0x47   :  { %vm384_vm11 = vcmp.lt.s32.totalorder %v383_v40, 0 }
  0x48   :  { %v146_v41 = vsel %vm384_vm11, 0, %v383_v40 }
  0x49   :  { %v147_v42 = vsub.s32 32, %v146_v41  ;;  %v148_v43 = vshll.u32 %v139_v36, %v146_v41  ;;  %v151_v44 = vsub.s32 4294967266, %v146_v41 }
  0x4b   :  { %v149_v32 = vshrl.u32 %v131_v14, %v147_v42  ;;  %v152_v45 = vadd.s32 127, %v151_v44 }
  0x4d   :  { %v150_v46 = vor.u32 %v149_v32, %v148_v43  ;;  %v153_v47 = vshll.u32 %v152_v45, 23 }
  0x4f   :  { %v154_v48 = vor.u32 4788187, %v153_v47  ;;  %v157_v49 = vcvt.s32.f32 %v150_v46 }
  0x51   :  { %v155_v50 = vand.u32 2147483647, %v154_v48 }
  0x53   :  { %v158_v51 = vmul.f32 %v157_v49, %v155_v50 }
  0x55   :  { %v159_v53 = vxor.u32 2147483648, %v158_v51 }
  0x57   :  { %v160_v54 = vsel %vm39_vm12, %v159_v53, %v158_v51 }
  0x58   :  { %v163_v56 = vsel %vm38_vm13, %v505_v4, %v160_v54 }
  0x59   :  { %v165_v57 = vmul.f32 %v163_v56, %v163_v56 }
  0x5b   :  { %v166_v59 = vmul.f32 -0.001358992, %v165_v57  ;;  %v173_v60 = vmul.f32 -0.00019511016, %v165_v57 }
  0x5d   :  { %v167_v61 = vadd.f32 0.041655596, %v166_v59  ;;  %v174_v62 = vadd.f32 0.008332121, %v173_v60 }
  0x5f   :  { %v168_v0 = vmul.f32 %v167_v61, %v165_v57  ;;  %v175_v1 = vmul.f32 %v174_v62, %v165_v57 }
  0x61   :  { %v169_v2 = vadd.f32 -0.4999988, %v168_v0  ;;  %v176_v3 = vadd.f32 -0.16666654, %v175_v1 }
  0x63   :  { %v170_v8 = vmul.f32 %v169_v2, %v165_v57  ;;  %v177_v7 = vmul.f32 %v176_v3, %v165_v57 }
  0x65   :  { %v171_v9 = vadd.f32 1.0, %v170_v8  ;;  %v178_v10 = vadd.f32 1.0, %v177_v7 }
  0x67   :  { %v179_v11 = vmul.f32 %v178_v10, %v163_v56  ;;  %v187_v12 = vxor.u32 2147483648, %v171_v9 }
  0x69   :  { %v184_v13 = vxor.u32 2147483648, %v179_v11  ;;  %v188_v15 = vsel %vm186_vm14, %v187_v12, %v179_v11  ;;  %v345_v16 = vsel %vm343_vm15, %v187_v12, %v179_v11 }
  0x6b   :  { %v185_v17 = vsel %vm183_vm1, %v171_v9, %v184_v13  ;;  %v342_v18 = vsel %vm340_vm2, %v171_v9, %v184_v13 }
  0x6c   :  { %v189_v19 = vsel %vm182_vm0, %v185_v17, %v188_v15  ;;  %v346_v20 = vsel %vm339_vm3, %v342_v18, %v345_v16 }
  0x6d   :  { %v190_v21 = vsel %vm180_vm4, nan, %v189_v19  ;;  %v347_v22 = vsel %vm180_vm4, nan, %v346_v20 }
  0x6e   :  { %192 = vst.msk [vmem:[#allocation5] sm:$0xff] %vm191_vm5, %v190_v21 }
  0x6f   :  { %348 = vst.msk [vmem:[#allocation6] sm:$0xff] %vm191_vm5, %v347_v22  ;;  %359 = dma.vmem_to_hbm [thread:$0]  %s355_s14, 128, %s357_s17, [#allocation4]  }
  0x70   :  { %370 = dma.vmem_to_hbm [thread:$0]  %s366_s19, 128, %s368_s22, [#allocation7]  }
  0x71   :  { %473 = dma.done.wait [#allocation4], 128  }
  0x72   :  { %474 = vsyncadd [#allocation4], 4294967168 }
  0x73   :  { %475 = dma.done.wait [#allocation7], 128  }
  0x74   :  { %476 = vsyncadd [#allocation7], 4294967168 }
  0x75   :  { %379 = vsyncpa [#allocation3], 1 }
  0x76   :  { %380 = vsyncpa [#allocation4], 1 }
  0x77   :  { %381 = vsyncpa [#allocation7], 1 }

</bundles_post_ra>
